<compile_context>
chip_gen: v7x
topology: tpu7x:2x2x1
jax: 0.10.0
libtpu: 0.0.40
codegen_flags: <defaults>
</compile_context>

<pallas_src>
import jax
import jax.numpy as jnp
import numpy as np
from jax import lax
from jax.experimental import pallas as pl
from jax.experimental.pallas import tpu as pltpu


# ----------------------------------------------------------------------------
# Pallas kernel: one grid step == (one batch element, one H*W tile).
# ----------------------------------------------------------------------------
def lmasked_conv2d_kernel(
    v_patch_ref,   # (1, NVT*C, THW)  shifted-window stack, vertical stream
    h_patch_ref,   # (1, NHT*C, THW)  shifted-window stack, horizontal stream
    cond_ref,      # (1, Cc, THW)     conditional "image"
    hxin_ref,      # (1, C, THW)      horizontal input (for the residual)
    vw_ref,        # (2C, NVT*C)      fused live vertical-conv taps
    hw_ref,        # (2C, NHT*C)      fused live horizontal-conv taps
    tohori_ref,    # (2C, 2C)         1x1 conv (out, in)
    tores_ref,     # (C, C)           1x1 conv (out, in)
    vvf_w_ref, vvf_b_ref,   # (C, Cc), (C, 1)
    vvg_w_ref, vvg_b_ref,
    vhf_w_ref, vhf_b_ref,
    vhg_w_ref, vhg_b_ref,
    vx_out_ref,    # (1, C, THW)
    hx_out_ref,    # (1, C, THW)
):
  c = tores_ref.shape[0]

  # Masked convs: one fused long-contraction matmul per stream (MXU, f32 acc).
  vx = jnp.dot(vw_ref[...], v_patch_ref[0], preferred_element_type=jnp.float32)
  hx = jnp.dot(hw_ref[...], h_patch_ref[0], preferred_element_type=jnp.float32)

  # hv connection: hx = hx + tohori(vx)   (uses the pre-gate vx).
  hx = hx + jnp.dot(tohori_ref[...], vx, preferred_element_type=jnp.float32)

  cond = cond_ref[0]                     # (Cc, THW), f32

  # gate(vx, h, (vvf, vvg))
  tan_b_v = jnp.dot(vvf_w_ref[...], cond,
                    preferred_element_type=jnp.float32) + vvf_b_ref[...]
  sig_b_v = jnp.dot(vvg_w_ref[...], cond,
                    preferred_element_type=jnp.float32) + vvg_b_ref[...]
  vx_g = jnp.tanh(vx[:c] + tan_b_v) * jax.nn.sigmoid(vx[c:] + sig_b_v)

  # gate(hx, h, (vhf, vhg))
  tan_b_h = jnp.dot(vhf_w_ref[...], cond,
                    preferred_element_type=jnp.float32) + vhf_b_ref[...]
  sig_b_h = jnp.dot(vhg_w_ref[...], cond,
                    preferred_element_type=jnp.float32) + vhg_b_ref[...]
  hx_g = jnp.tanh(hx[:c] + tan_b_h) * jax.nn.sigmoid(hx[c:] + sig_b_h)

  # residual: hx = hxin + tores(hx)
  hx_res = hxin_ref[0] + jnp.dot(tores_ref[...], hx_g,
                                 preferred_element_type=jnp.float32)

  vx_out_ref[0] = vx_g.astype(vx_out_ref.dtype)
  hx_out_ref[0] = hx_res.astype(hx_out_ref.dtype)


# ----------------------------------------------------------------------------
# JAX glue
# ----------------------------------------------------------------------------
def _shifted_stack(x_nchw, taps, pad):
  """x: (B, C, H, W); taps: [(ky, kx)]; pad: ((top, bot), (left, right)).

  Returns (B, n_tap*C, H*W) with the contraction axis ordered tap-major,
  channel-minor (matches the fused weight layout).
  """
  b, c, hgt, wid = x_nchw.shape
  (pt, pb), (pleft, pright) = pad
  xp = jnp.pad(x_nchw, ((0, 0), (0, 0), (pt, pb), (pleft, pright)))
  views = [xp[:, :, ky:ky + hgt, kx:kx + wid].reshape(b, c, hgt * wid)
           for ky, kx in taps]
  return jnp.concatenate(views, axis=1)


def _pick_tile_hw(hw, max_tile):
  """Largest lane-aligned (multiple-of-128) divisor of hw that is <= max_tile;
  falls back to the full extent when hw is not lane-aligned."""
  if hw % 128 != 0 or hw <= max_tile:
    return hw
  t = max((max_tile // 128) * 128, 128)
  while hw % t != 0:
    t -= 128
  return t


def _vmem_limit_bytes():
  # Explicit scoped-VMEM limit: ~75% of physical VMEM (~96 MiB on v5e/v6e,
  # ~48 MiB on v7x) instead of the 16/32 MiB scoped defaults.
  cap = 64 * 1024 * 1024
  try:
    cap = int(getattr(pltpu.get_tpu_info(), "vmem_capacity_bytes", cap))
  except Exception:
    pass
  return (cap * 3) // 4


def _masks(channels, k, f=2):
  m = k // 2
  vmask = jnp.ones((channels * f, channels, k, k), jnp.float32)
  vmask = vmask.at[:, :, m:, :].set(0.0)
  hmask = jnp.ones((channels * f, channels, 1, k), jnp.float32)
  hmask = hmask.at[:, :, :, m:].set(0.0)   # self_connection = False
  return vmask, hmask


def lmasked_conv2d_forward(params, vxin, vhxin, cond_img, k=7, padding=3,
                           conv_dtype=jnp.bfloat16, max_tile_hw=1024):
  """Mirrors LMaskedConv2d.forward (gates / hv / res connections on,
  self_connection=False, colors=1).

  Returns ((vx,), hx) — the torch module returns only (vx,); hx (the
  internal horizontal-stream result) is exposed here for validation.
  """
  B, C, H, W = vxin.shape
  Cc = cond_img.shape[1]
  F2 = 2
  HW = H * W
  m = k // 2
  assert padding == m

  # ---- prune structurally-zero taps (pruning == masking, self_conn=False) --
  vw_live = params["vertical_w"][:, :, :m, :]        # (2C, C, m, k)
  hw_live = params["horizontal_w"][:, :, 0, :m]      # (2C, C, m)

  # Fused per-stream weights; contraction axis ordered (tap, in_channel).
  vw_fused = jnp.transpose(vw_live, (0, 2, 3, 1)).reshape(F2 * C, m * k * C)
  hw_fused = jnp.transpose(hw_live, (0, 2, 1)).reshape(F2 * C, m * C)
  vw_fused = vw_fused.astype(conv_dtype)
  hw_fused = hw_fused.astype(conv_dtype)

  # ---- shifted-window stacks over the live taps only (NC(HW) layout) -------
  v_taps = [(ky, kx) for ky in range(m) for kx in range(k)]   # rows above only
  h_taps = [(0, kx) for kx in range(m)]                       # cols left only
  v_patch = _shifted_stack(vxin, v_taps, ((m, 0), (m, m))).astype(conv_dtype)
  h_patch = _shifted_stack(vhxin, h_taps, ((0, 0), (m, 0))).astype(conv_dtype)

  cond = cond_img.reshape(B, Cc, HW)
  hxin_flat = vhxin.reshape(B, C, HW)

  w1 = lambda w: w[:, :, 0, 0]          # (O, I, 1, 1) -> (O, I)
  b1 = lambda b: b.reshape(-1, 1)       # (O,) -> (O, 1)
  tohori_w = w1(params["tohori_w"])
  tores_w = w1(params["tores_w"])
  vvf_w, vvf_b = w1(params["vvf_w"]), b1(params["vvf_b"])
  vvg_w, vvg_b = w1(params["vvg_w"]), b1(params["vvg_b"])
  vhf_w, vhf_b = w1(params["vhf_w"]), b1(params["vhf_b"])
  vhg_w, vhg_b = w1(params["vhg_w"]), b1(params["vhg_b"])

  inputs = (v_patch, h_patch, cond, hxin_flat,
            vw_fused, hw_fused, tohori_w, tores_w,
            vvf_w, vvf_b, vvg_w, vvg_b, vhf_w, vhf_b, vhg_w, vhg_b)

  tile_hw = _pick_tile_hw(HW, max_tile_hw)
  grid = (B, HW // tile_hw)

  def tile_spec(chan):
    return pl.BlockSpec((1, chan, tile_hw), lambda b, t: (b, 0, t))

  def weight_spec(arr):
    return pl.BlockSpec(arr.shape, lambda b, t: (0,) * arr.ndim)

  in_specs = ([tile_spec(a.shape[1]) for a in inputs[:4]] +
              [weight_spec(a) for a in inputs[4:]])
  out_specs = (pl.BlockSpec((1, C, tile_hw), lambda b, t: (b, 0, t)),
               pl.BlockSpec((1, C, tile_hw), lambda b, t: (b, 0, t)))
  out_shape = (jax.ShapeDtypeStruct((B, C, HW), jnp.float32),
               jax.ShapeDtypeStruct((B, C, HW), jnp.float32))

  nbytes = lambda a: int(a.size) * int(a.dtype.itemsize)
  cost = pl.CostEstimate(
      flops=2 * B * HW * (F2 * C * (m * k * C) + F2 * C * (m * C)
                          + (F2 * C) ** 2 + C * C + 4 * C * Cc),
      transcendentals=4 * B * HW * C,
      bytes_accessed=sum(nbytes(a) for a in inputs) + 2 * B * HW * C * 4,
  )

  vx_flat, hx_flat = pl.pallas_call(
      lmasked_conv2d_kernel,
      out_shape=out_shape,
      grid=grid,
      in_specs=in_specs,
      out_specs=out_specs,
      compiler_params=pltpu.CompilerParams(
          dimension_semantics=("parallel", "parallel"),
          vmem_limit_bytes=_vmem_limit_bytes()),
      cost_estimate=cost,
  )(*inputs)

  # (B, C, HW) is already NCHW-flat: no output transpose needed.
  return (vx_flat.reshape(B, C, H, W),), hx_flat.reshape(B, C, H, W)


# ----------------------------------------------------------------------------
# Pure-JAX reference (mirrors the torch forward), used for validation.
# ----------------------------------------------------------------------------
def reference_forward(params, vxin, vhxin, cond_img, k=7, padding=3):
  C = vxin.shape[1]
  vmask, hmask = _masks(C, k, 2)
  vw = params["vertical_w"] * vmask
  hw = params["horizontal_w"] * hmask
  dn = ("NCHW", "OIHW", "NCHW")

  def conv(x, w, pad):
    return lax.conv_general_dilated(x, w, (1, 1), pad, dimension_numbers=dn)

  def conv1(x, w, b=None):
    out = conv(x, w, [(0, 0), (0, 0)])
    if b is not None:
      out = out + b.reshape(1, -1, 1, 1)
    return out

  vx = conv(vxin, vw, [(padding, padding), (padding, padding)])
  hx = conv(vhxin, hw, [(0, 0), (padding, padding)])
  hx = hx + conv1(vx, params["tohori_w"])

  def gate(x, cond, wf, bf, wg, bg):
    half = x.shape[1] // 2
    tanb = conv1(cond, wf, bf)
    sigb = conv1(cond, wg, bg)
    return jnp.tanh(x[:, :half] + tanb) * jax.nn.sigmoid(x[:, half:] + sigb)

  vx_g = gate(vx, cond_img, params["vvf_w"], params["vvf_b"],
              params["vvg_w"], params["vvg_b"])
  hx_g = gate(hx, cond_img, params["vhf_w"], params["vhf_b"],
              params["vhg_w"], params["vhg_b"])
  hx_out = vhxin + conv1(hx_g, params["tores_w"])
  return (vx_g,), hx_out


# ----------------------------------------------------------------------------
if __name__ == "__main__":
  B, C, Cc, H, W, K = 2, 4, 8, 16, 16, 7

  key = jax.random.PRNGKey(0)
  keys = jax.random.split(key, 16)
  init = lambda kk, shape, s=0.1: (s * jax.random.normal(kk, shape)).astype(jnp.float32)

  params = {
      "vertical_w":   init(keys[0], (2 * C, C, K, K)),
      "horizontal_w": init(keys[1], (2 * C, C, 1, K)),
      "tohori_w":     init(keys[2], (2 * C, 2 * C, 1, 1)),
      "tores_w":      init(keys[3], (C, C, 1, 1)),
      "vhf_w": init(keys[4], (C, Cc, 1, 1)), "vhf_b": init(keys[5], (C,)),
      "vhg_w": init(keys[6], (C, Cc, 1, 1)), "vhg_b": init(keys[7], (C,)),
      "vvf_w": init(keys[8], (C, Cc, 1, 1)), "vvf_b": init(keys[9], (C,)),
      "vvg_w": init(keys[10], (C, Cc, 1, 1)), "vvg_b": init(keys[11], (C,)),
  }

  vxin = jax.random.normal(keys[12], (B, C, H, W), jnp.float32)
  hxin = jax.random.normal(keys[13], (B, C, H, W), jnp.float32)
  cond = jax.random.normal(keys[14], (B, Cc, H, W), jnp.float32)

  (vx_r,), hx_r = reference_forward(params, vxin, hxin, cond)

  # Default fast path: bf16 masked-conv operands, f32 MXU accumulation.
  (vx_k,), hx_k = lmasked_conv2d_forward(params, vxin, hxin, cond)
  jax.block_until_ready((vx_k, hx_k))
  np.testing.assert_allclose(np.asarray(vx_k), np.asarray(vx_r),
                             rtol=5e-2, atol=5e-2)
  np.testing.assert_allclose(np.asarray(hx_k), np.asarray(hx_r),
                             rtol=5e-2, atol=5e-2)

  # Full-f32 path (also exercises multi-tile HW grid): tight check.
  (vx_k32,), hx_k32 = lmasked_conv2d_forward(
      params, vxin, hxin, cond, conv_dtype=jnp.float32, max_tile_hw=128)
  jax.block_until_ready((vx_k32, hx_k32))
  np.testing.assert_allclose(np.asarray(vx_k32), np.asarray(vx_r),
                             rtol=1e-4, atol=1e-4)
  np.testing.assert_allclose(np.asarray(hx_k32), np.asarray(hx_r),
                             rtol=1e-4, atol=1e-4)

  print("KERNEL_OK")
</pallas_src>

<mosaic_0001>
module attributes {stable_mosaic.version = 11 : i64} {
  func.func @lmasked_conv2d_kernel(%arg0: i32, %arg1: i32, %arg2: memref<1x84x256xbf16, #tpu.memory_space<vmem>>, %arg3: memref<1x12x256xbf16, #tpu.memory_space<vmem>>, %arg4: memref<1x8x256xf32, #tpu.memory_space<vmem>>, %arg5: memref<1x4x256xf32, #tpu.memory_space<vmem>>, %arg6: memref<8x84xbf16, #tpu.memory_space<vmem>>, %arg7: memref<8x12xbf16, #tpu.memory_space<vmem>>, %arg8: memref<8x8xf32, #tpu.memory_space<vmem>>, %arg9: memref<4x4xf32, #tpu.memory_space<vmem>>, %arg10: memref<4x8xf32, #tpu.memory_space<vmem>>, %arg11: memref<4x1xf32, #tpu.memory_space<vmem>>, %arg12: memref<4x8xf32, #tpu.memory_space<vmem>>, %arg13: memref<4x1xf32, #tpu.memory_space<vmem>>, %arg14: memref<4x8xf32, #tpu.memory_space<vmem>>, %arg15: memref<4x1xf32, #tpu.memory_space<vmem>>, %arg16: memref<4x8xf32, #tpu.memory_space<vmem>>, %arg17: memref<4x1xf32, #tpu.memory_space<vmem>>, %arg18: memref<1x4x256xf32, #tpu.memory_space<vmem>>, %arg19: memref<1x4x256xf32, #tpu.memory_space<vmem>>) attributes {dimension_semantics = [#tpu.dimension_semantics<parallel>, #tpu.dimension_semantics<parallel>], iteration_bounds = array<i64: 2, 1>, scalar_prefetch = 0 : i64, scratch_operands = 0 : i64, tpu.core_type = #tpu.core_type<tc>, window_params = [{transform_indices = @transform_0, window_bounds = array<i64: 1, 84, 256>}, {transform_indices = @transform_1, window_bounds = array<i64: 1, 12, 256>}, {transform_indices = @transform_2, window_bounds = array<i64: 1, 8, 256>}, {transform_indices = @transform_3, window_bounds = array<i64: 1, 4, 256>}, {pipeline_mode = #tpu.pipeline_mode<synchronous>, transform_indices = @transform_4, window_bounds = array<i64: 8, 84>}, {pipeline_mode = #tpu.pipeline_mode<synchronous>, transform_indices = @transform_5, window_bounds = array<i64: 8, 12>}, {pipeline_mode = #tpu.pipeline_mode<synchronous>, transform_indices = @transform_6, window_bounds = array<i64: 8, 8>}, {pipeline_mode = #tpu.pipeline_mode<synchronous>, transform_indices = @transform_7, window_bounds = array<i64: 4, 4>}, {pipeline_mode = #tpu.pipeline_mode<synchronous>, transform_indices = @transform_8, window_bounds = array<i64: 4, 8>}, {pipeline_mode = #tpu.pipeline_mode<synchronous>, transform_indices = @transform_9, window_bounds = array<i64: 4, 1>}, {pipeline_mode = #tpu.pipeline_mode<synchronous>, transform_indices = @transform_10, window_bounds = array<i64: 4, 8>}, {pipeline_mode = #tpu.pipeline_mode<synchronous>, transform_indices = @transform_11, window_bounds = array<i64: 4, 1>}, {pipeline_mode = #tpu.pipeline_mode<synchronous>, transform_indices = @transform_12, window_bounds = array<i64: 4, 8>}, {pipeline_mode = #tpu.pipeline_mode<synchronous>, transform_indices = @transform_13, window_bounds = array<i64: 4, 1>}, {pipeline_mode = #tpu.pipeline_mode<synchronous>, transform_indices = @transform_14, window_bounds = array<i64: 4, 8>}, {pipeline_mode = #tpu.pipeline_mode<synchronous>, transform_indices = @transform_15, window_bounds = array<i64: 4, 1>}, {transform_indices = @transform_16, window_bounds = array<i64: 1, 4, 256>}, {transform_indices = @transform_17, window_bounds = array<i64: 1, 4, 256>}]} {
    %c0 = arith.constant 0 : index
    %c0_0 = arith.constant 0 : index
    %0 = vector.load %arg6[%c0, %c0_0] : memref<8x84xbf16, #tpu.memory_space<vmem>>, vector<8x84xbf16>
    %c0_1 = arith.constant 0 : index
    %c0_2 = arith.constant 0 : index
    %c0_3 = arith.constant 0 : index
    %1 = vector.load %arg2[%c0_1, %c0_2, %c0_3] : memref<1x84x256xbf16, #tpu.memory_space<vmem>>, vector<1x84x256xbf16>
    %2 = vector.shape_cast %1 : vector<1x84x256xbf16> to vector<84x256xbf16>
    %cst = arith.constant dense<0.000000e+00> : vector<8x256xf32>
    %3 = tpu.matmul %0, %2, %cst {dimension_numbers = #tpu.dot_dimension_numbers<[1], [0], [0], [1], [0, 0, 1, 1], [], []>} : vector<8x84xbf16>, vector<84x256xbf16>, vector<8x256xf32> -> vector<8x256xf32>
    %c0_4 = arith.constant 0 : index
    %c0_5 = arith.constant 0 : index
    %4 = vector.load %arg7[%c0_4, %c0_5] : memref<8x12xbf16, #tpu.memory_space<vmem>>, vector<8x12xbf16>
    %c0_6 = arith.constant 0 : index
    %c0_7 = arith.constant 0 : index
    %c0_8 = arith.constant 0 : index
    %5 = vector.load %arg3[%c0_6, %c0_7, %c0_8] : memref<1x12x256xbf16, #tpu.memory_space<vmem>>, vector<1x12x256xbf16>
    %6 = vector.shape_cast %5 : vector<1x12x256xbf16> to vector<12x256xbf16>
    %cst_9 = arith.constant dense<0.000000e+00> : vector<8x256xf32>
    %7 = tpu.matmul %4, %6, %cst_9 {dimension_numbers = #tpu.dot_dimension_numbers<[1], [0], [0], [1], [0, 0, 1, 1], [], []>} : vector<8x12xbf16>, vector<12x256xbf16>, vector<8x256xf32> -> vector<8x256xf32>
    %c0_10 = arith.constant 0 : index
    %c0_11 = arith.constant 0 : index
    %8 = vector.load %arg8[%c0_10, %c0_11] : memref<8x8xf32, #tpu.memory_space<vmem>>, vector<8x8xf32>
    %cst_12 = arith.constant dense<0.000000e+00> : vector<8x256xf32>
    %9 = tpu.matmul %8, %3, %cst_12 {dimension_numbers = #tpu.dot_dimension_numbers<[1], [0], [0], [1], [0, 0, 1, 1], [], []>} : vector<8x8xf32>, vector<8x256xf32>, vector<8x256xf32> -> vector<8x256xf32>
    %10 = arith.addf %7, %9 : vector<8x256xf32>
    %c0_13 = arith.constant 0 : index
    %c0_14 = arith.constant 0 : index
    %c0_15 = arith.constant 0 : index
    %11 = vector.load %arg4[%c0_13, %c0_14, %c0_15] : memref<1x8x256xf32, #tpu.memory_space<vmem>>, vector<1x8x256xf32>
    %12 = vector.shape_cast %11 : vector<1x8x256xf32> to vector<8x256xf32>
    %c0_16 = arith.constant 0 : index
    %c0_17 = arith.constant 0 : index
    %13 = vector.load %arg10[%c0_16, %c0_17] : memref<4x8xf32, #tpu.memory_space<vmem>>, vector<4x8xf32>
    %cst_18 = arith.constant dense<0.000000e+00> : vector<4x256xf32>
    %14 = tpu.matmul %13, %12, %cst_18 {dimension_numbers = #tpu.dot_dimension_numbers<[1], [0], [0], [1], [0, 0, 1, 1], [], []>} : vector<4x8xf32>, vector<8x256xf32>, vector<4x256xf32> -> vector<4x256xf32>
    %c0_19 = arith.constant 0 : index
    %c0_20 = arith.constant 0 : index
    %15 = vector.load %arg11[%c0_19, %c0_20] : memref<4x1xf32, #tpu.memory_space<vmem>>, vector<4x1xf32>
    %16 = vector.broadcast %15 : vector<4x1xf32> to vector<4x256xf32>
    %17 = arith.addf %14, %16 : vector<4x256xf32>
    %c0_21 = arith.constant 0 : index
    %c0_22 = arith.constant 0 : index
    %18 = vector.load %arg12[%c0_21, %c0_22] : memref<4x8xf32, #tpu.memory_space<vmem>>, vector<4x8xf32>
    %cst_23 = arith.constant dense<0.000000e+00> : vector<4x256xf32>
    %19 = tpu.matmul %18, %12, %cst_23 {dimension_numbers = #tpu.dot_dimension_numbers<[1], [0], [0], [1], [0, 0, 1, 1], [], []>} : vector<4x8xf32>, vector<8x256xf32>, vector<4x256xf32> -> vector<4x256xf32>
    %c0_24 = arith.constant 0 : index
    %c0_25 = arith.constant 0 : index
    %20 = vector.load %arg13[%c0_24, %c0_25] : memref<4x1xf32, #tpu.memory_space<vmem>>, vector<4x1xf32>
    %21 = vector.broadcast %20 : vector<4x1xf32> to vector<4x256xf32>
    %22 = arith.addf %19, %21 : vector<4x256xf32>
    %23 = vector.extract_strided_slice %3 {offsets = [0, 0], sizes = [4, 256], strides = [1, 1]} : vector<8x256xf32> to vector<4x256xf32>
    %24 = arith.addf %23, %17 : vector<4x256xf32>
    %25 = math.tanh %24 : vector<4x256xf32>
    %26 = vector.extract_strided_slice %3 {offsets = [4, 0], sizes = [4, 256], strides = [1, 1]} : vector<8x256xf32> to vector<4x256xf32>
    %27 = arith.addf %26, %22 : vector<4x256xf32>
    %28 = arith.negf %27 : vector<4x256xf32>
    %29 = math.exp %28 : vector<4x256xf32>
    %cst_26 = arith.constant 1.000000e+00 : f32
    %30 = vector.broadcast %cst_26 : f32 to vector<4x256xf32>
    %31 = arith.addf %30, %29 : vector<4x256xf32>
    %32 = arith.divf %30, %31 : vector<4x256xf32>
    %33 = arith.mulf %25, %32 : vector<4x256xf32>
    %c0_27 = arith.constant 0 : index
    %c0_28 = arith.constant 0 : index
    %34 = vector.load %arg14[%c0_27, %c0_28] : memref<4x8xf32, #tpu.memory_space<vmem>>, vector<4x8xf32>
    %cst_29 = arith.constant dense<0.000000e+00> : vector<4x256xf32>
    %35 = tpu.matmul %34, %12, %cst_29 {dimension_numbers = #tpu.dot_dimension_numbers<[1], [0], [0], [1], [0, 0, 1, 1], [], []>} : vector<4x8xf32>, vector<8x256xf32>, vector<4x256xf32> -> vector<4x256xf32>
    %c0_30 = arith.constant 0 : index
    %c0_31 = arith.constant 0 : index
    %36 = vector.load %arg15[%c0_30, %c0_31] : memref<4x1xf32, #tpu.memory_space<vmem>>, vector<4x1xf32>
    %37 = vector.broadcast %36 : vector<4x1xf32> to vector<4x256xf32>
    %38 = arith.addf %35, %37 : vector<4x256xf32>
    %c0_32 = arith.constant 0 : index
    %c0_33 = arith.constant 0 : index
    %39 = vector.load %arg16[%c0_32, %c0_33] : memref<4x8xf32, #tpu.memory_space<vmem>>, vector<4x8xf32>
    %cst_34 = arith.constant dense<0.000000e+00> : vector<4x256xf32>
    %40 = tpu.matmul %39, %12, %cst_34 {dimension_numbers = #tpu.dot_dimension_numbers<[1], [0], [0], [1], [0, 0, 1, 1], [], []>} : vector<4x8xf32>, vector<8x256xf32>, vector<4x256xf32> -> vector<4x256xf32>
    %c0_35 = arith.constant 0 : index
    %c0_36 = arith.constant 0 : index
    %41 = vector.load %arg17[%c0_35, %c0_36] : memref<4x1xf32, #tpu.memory_space<vmem>>, vector<4x1xf32>
    %42 = vector.broadcast %41 : vector<4x1xf32> to vector<4x256xf32>
    %43 = arith.addf %40, %42 : vector<4x256xf32>
    %44 = vector.extract_strided_slice %10 {offsets = [0, 0], sizes = [4, 256], strides = [1, 1]} : vector<8x256xf32> to vector<4x256xf32>
    %45 = arith.addf %44, %38 : vector<4x256xf32>
    %46 = math.tanh %45 : vector<4x256xf32>
    %47 = vector.extract_strided_slice %10 {offsets = [4, 0], sizes = [4, 256], strides = [1, 1]} : vector<8x256xf32> to vector<4x256xf32>
    %48 = arith.addf %47, %43 : vector<4x256xf32>
    %49 = arith.negf %48 : vector<4x256xf32>
    %50 = math.exp %49 : vector<4x256xf32>
    %cst_37 = arith.constant 1.000000e+00 : f32
    %51 = vector.broadcast %cst_37 : f32 to vector<4x256xf32>
    %52 = arith.addf %51, %50 : vector<4x256xf32>
    %53 = arith.divf %51, %52 : vector<4x256xf32>
    %54 = arith.mulf %46, %53 : vector<4x256xf32>
    %c0_38 = arith.constant 0 : index
    %c0_39 = arith.constant 0 : index
    %c0_40 = arith.constant 0 : index
    %55 = vector.load %arg5[%c0_38, %c0_39, %c0_40] : memref<1x4x256xf32, #tpu.memory_space<vmem>>, vector<1x4x256xf32>
    %56 = vector.shape_cast %55 : vector<1x4x256xf32> to vector<4x256xf32>
    %c0_41 = arith.constant 0 : index
    %c0_42 = arith.constant 0 : index
    %57 = vector.load %arg9[%c0_41, %c0_42] : memref<4x4xf32, #tpu.memory_space<vmem>>, vector<4x4xf32>
    %cst_43 = arith.constant dense<0.000000e+00> : vector<4x256xf32>
    %58 = tpu.matmul %57, %54, %cst_43 {dimension_numbers = #tpu.dot_dimension_numbers<[1], [0], [0], [1], [0, 0, 1, 1], [], []>} : vector<4x4xf32>, vector<4x256xf32>, vector<4x256xf32> -> vector<4x256xf32>
    %59 = arith.addf %56, %58 : vector<4x256xf32>
    %c0_44 = arith.constant 0 : index
    %c0_45 = arith.constant 0 : index
    %c0_46 = arith.constant 0 : index
    %60 = vector.load %arg18[%c0_44, %c0_45, %c0_46] : memref<1x4x256xf32, #tpu.memory_space<vmem>>, vector<1x4x256xf32>
    %61 = vector.shape_cast %60 : vector<1x4x256xf32> to vector<4x256xf32>
    %62 = vector.shape_cast %33 : vector<4x256xf32> to vector<1x4x256xf32>
    tpu.vector_store %arg18[%c0_44, %c0_45, %c0_46], %62 {strides = array<i32>} : memref<1x4x256xf32, #tpu.memory_space<vmem>>, vector<1x4x256xf32>,
    %c0_47 = arith.constant 0 : index
    %c0_48 = arith.constant 0 : index
    %c0_49 = arith.constant 0 : index
    %63 = vector.load %arg19[%c0_47, %c0_48, %c0_49] : memref<1x4x256xf32, #tpu.memory_space<vmem>>, vector<1x4x256xf32>
    %64 = vector.shape_cast %63 : vector<1x4x256xf32> to vector<4x256xf32>
    %65 = vector.shape_cast %59 : vector<4x256xf32> to vector<1x4x256xf32>
    tpu.vector_store %arg19[%c0_47, %c0_48, %c0_49], %65 {strides = array<i32>} : memref<1x4x256xf32, #tpu.memory_space<vmem>>, vector<1x4x256xf32>,
    return
  }
  func.func @transform_0(%arg0: i32, %arg1: i32) -> (i32, i32, i32) {
    %c0_i32 = arith.constant 0 : i32
    %c0_i32_0 = arith.constant 0 : i32
    return %arg0, %c0_i32, %arg1 : i32, i32, i32
  }
  func.func @transform_1(%arg0: i32, %arg1: i32) -> (i32, i32, i32) {
    %c0_i32 = arith.constant 0 : i32
    %c0_i32_0 = arith.constant 0 : i32
    return %arg0, %c0_i32, %arg1 : i32, i32, i32
  }
  func.func @transform_2(%arg0: i32, %arg1: i32) -> (i32, i32, i32) {
    %c0_i32 = arith.constant 0 : i32
    %c0_i32_0 = arith.constant 0 : i32
    return %arg0, %c0_i32, %arg1 : i32, i32, i32
  }
  func.func @transform_3(%arg0: i32, %arg1: i32) -> (i32, i32, i32) {
    %c0_i32 = arith.constant 0 : i32
    %c0_i32_0 = arith.constant 0 : i32
    return %arg0, %c0_i32, %arg1 : i32, i32, i32
  }
  func.func @transform_4(%arg0: i32, %arg1: i32) -> (i32, i32) {
    %c0_i32 = arith.constant 0 : i32
    %c0_i32_0 = arith.constant 0 : i32
    %c0_i32_1 = arith.constant 0 : i32
    return %c0_i32, %c0_i32_0 : i32, i32
  }
  func.func @transform_5(%arg0: i32, %arg1: i32) -> (i32, i32) {
    %c0_i32 = arith.constant 0 : i32
    %c0_i32_0 = arith.constant 0 : i32
    %c0_i32_1 = arith.constant 0 : i32
    return %c0_i32, %c0_i32_0 : i32, i32
  }
  func.func @transform_6(%arg0: i32, %arg1: i32) -> (i32, i32) {
    %c0_i32 = arith.constant 0 : i32
    %c0_i32_0 = arith.constant 0 : i32
    %c0_i32_1 = arith.constant 0 : i32
    return %c0_i32, %c0_i32_0 : i32, i32
  }
  func.func @transform_7(%arg0: i32, %arg1: i32) -> (i32, i32) {
    %c0_i32 = arith.constant 0 : i32
    %c0_i32_0 = arith.constant 0 : i32
    %c0_i32_1 = arith.constant 0 : i32
    return %c0_i32, %c0_i32_0 : i32, i32
  }
  func.func @transform_8(%arg0: i32, %arg1: i32) -> (i32, i32) {
    %c0_i32 = arith.constant 0 : i32
    %c0_i32_0 = arith.constant 0 : i32
    %c0_i32_1 = arith.constant 0 : i32
    return %c0_i32, %c0_i32_0 : i32, i32
  }
  func.func @transform_9(%arg0: i32, %arg1: i32) -> (i32, i32) {
    %c0_i32 = arith.constant 0 : i32
    %c0_i32_0 = arith.constant 0 : i32
    %c0_i32_1 = arith.constant 0 : i32
    return %c0_i32, %c0_i32_0 : i32, i32
  }
  func.func @transform_10(%arg0: i32, %arg1: i32) -> (i32, i32) {
    %c0_i32 = arith.constant 0 : i32
    %c0_i32_0 = arith.constant 0 : i32
    %c0_i32_1 = arith.constant 0 : i32
    return %c0_i32, %c0_i32_0 : i32, i32
  }
  func.func @transform_11(%arg0: i32, %arg1: i32) -> (i32, i32) {
    %c0_i32 = arith.constant 0 : i32
    %c0_i32_0 = arith.constant 0 : i32
    %c0_i32_1 = arith.constant 0 : i32
    return %c0_i32, %c0_i32_0 : i32, i32
  }
  func.func @transform_12(%arg0: i32, %arg1: i32) -> (i32, i32) {
    %c0_i32 = arith.constant 0 : i32
    %c0_i32_0 = arith.constant 0 : i32
    %c0_i32_1 = arith.constant 0 : i32
    return %c0_i32, %c0_i32_0 : i32, i32
  }
  func.func @transform_13(%arg0: i32, %arg1: i32) -> (i32, i32) {
    %c0_i32 = arith.constant 0 : i32
    %c0_i32_0 = arith.constant 0 : i32
    %c0_i32_1 = arith.constant 0 : i32
    return %c0_i32, %c0_i32_0 : i32, i32
  }
  func.func @transform_14(%arg0: i32, %arg1: i32) -> (i32, i32) {
    %c0_i32 = arith.constant 0 : i32
    %c0_i32_0 = arith.constant 0 : i32
    %c0_i32_1 = arith.constant 0 : i32
    return %c0_i32, %c0_i32_0 : i32, i32
  }
  func.func @transform_15(%arg0: i32, %arg1: i32) -> (i32, i32) {
    %c0_i32 = arith.constant 0 : i32
    %c0_i32_0 = arith.constant 0 : i32
    %c0_i32_1 = arith.constant 0 : i32
    return %c0_i32, %c0_i32_0 : i32, i32
  }
  func.func @transform_16(%arg0: i32, %arg1: i32) -> (i32, i32, i32) {
    %c0_i32 = arith.constant 0 : i32
    %c0_i32_0 = arith.constant 0 : i32
    return %arg0, %c0_i32, %arg1 : i32, i32, i32
  }
  func.func @transform_17(%arg0: i32, %arg1: i32) -> (i32, i32, i32) {
    %c0_i32 = arith.constant 0 : i32
    %c0_i32_0 = arith.constant 0 : i32
    return %arg0, %c0_i32, %arg1 : i32, i32, i32
  }
}

</mosaic_0001>

<bundles_post_ra>
// kernel: tpu_custom_call.1
= control target key start
LH: loop header
LB: loop body
LE: loop exit
PB: predicated region body
PF: predicated region fallthrough
CT: control target
= control target key end

     0   :  { %s2235_s0 = inlined_call_operand.vmem [shape: bf16[2,84,256], index: 0, kind: input, shape index: {}]   ;;  %s2236_s1 = inlined_call_operand.vmem [shape: bf16[2,12,256], index: 1, kind: input, shape index: {}]   ;;  %s2237_s2 = inlined_call_operand.vmem [shape: f32[2,8,256], index: 2, kind: input, shape index: {}]   ;;  %s2238_s3 = inlined_call_operand.vmem [shape: f32[2,4,256], index: 3, kind: input, shape index: {}]   ;;  %s2239_s4 = inlined_call_operand.vmem [shape: bf16[8,84], index: 4, kind: input, shape index: {}]   ;;  %s2240_s5 = inlined_call_operand.vmem [shape: bf16[8,12], index: 5, kind: input, shape index: {}]   ;;  %s2241_s6 = inlined_call_operand.vmem [shape: f32[8,8], index: 6, kind: input, shape index: {}]   ;;  %s2242_s7 = inlined_call_operand.vmem [shape: f32[4,4], index: 7, kind: input, shape index: {}]   ;;  %s2243_s8 = inlined_call_operand.vmem [shape: f32[4,8], index: 8, kind: input, shape index: {}]   ;;  %s2244_s9 = inlined_call_operand.vmem [shape: f32[4,1], index: 9, kind: input, shape index: {}]   ;;  %s2245_s10 = inlined_call_operand.vmem [shape: f32[4,8], index: 10, kind: input, shape index: {}]   ;;  %s2246_s11 = inlined_call_operand.vmem [shape: f32[4,1], index: 11, kind: input, shape index: {}]   ;;  %s2247_s12 = inlined_call_operand.vmem [shape: f32[4,8], index: 12, kind: input, shape index: {}]   ;;  %s2248_s13 = inlined_call_operand.vmem [shape: f32[4,1], index: 13, kind: input, shape index: {}]   ;;  %s2249_s14 = inlined_call_operand.vmem [shape: f32[4,8], index: 14, kind: input, shape index: {}]   ;;  %s2250_s15 = inlined_call_operand.vmem [shape: f32[4,1], index: 15, kind: input, shape index: {}]   ;;  %s2251_s16 = inlined_call_operand.hbm [shape: f32[2,4,256], index: 16, kind: output, shape index: {0}]   ;;  %s2252_s17 = inlined_call_operand.hbm [shape: f32[2,4,256], index: 17, kind: output, shape index: {1}]  }
   0x1   :  { %2262 = sst [smem:[#allocation15_spill]] %s2235_s0 }
   0x2   :  { %2263 = sst [smem:[#allocation16_spill]] %s2236_s1 }
   0x3   :  { %2264 = sst [smem:[#allocation17_spill]] %s2237_s2 }
   0x4   :  { %2265 = sst [smem:[#allocation18_spill]] %s2239_s4 }
   0x5   :  { %2266 = sst [smem:[#allocation19_spill]] %s2240_s5 }
   0x6   :  { %2267 = sst [smem:[#allocation20_spill]] %s2241_s6 }
   0x7   :  { %2268 = sst [smem:[#allocation21_spill]] %s2252_s17 }
   0x8   :  { %23 = vsyncpa [#allocation3], 0 }
   0x9   :  { %25 = vsyncpa [#allocation3 + $0x1], 0 }
   0xa   :  { %26 = vsyncpa [#allocation5], 0 }
   0xb   :  { %28 = vsyncpa [#allocation5 + $0x1], 0  ;;  %s2019_s24 = smov 0   ;;  %s2021_s25 = smov 0  }
   0xc   :  { %s2023_s26 = smov 0   ;;  %s2025_s27 = smov 0  }
   0xd   :  { %s2027_s28 = smov 0   ;;  %s2029_s29 = smov 0  }
   0xe LB: > { %2269 = sst [smem:[#allocation8_spill]] %s1903_s24  ;;  %s1647_s0 = sadd.s32 4294967295, %s1923_s29   ;;  %s1923_s29 = sphi %s2029_s29, %s34_s29   ;;  %s1919_s28 = sphi %s2027_s28, %s2292_s28   ;;  %s1915_s27 = sphi %s2025_s27, %s2291_s27   ;;  %s1911_s26 = sphi %s2023_s26, %s2290_s26   ;;  %s1907_s25 = sphi %s2021_s25, %s2294_s25   ;;  %s1903_s24 = sphi %s2019_s24, %s2293_s24  }
   0xf   : > { %2270 = sst [smem:[#allocation9_spill]] %s1911_s26  ;;  %s1648_s30 = sadd.s32 4294967294, %s1923_s29  }
  0x10   : > { %2271 = sst [smem:[#allocation10_spill]] %s1919_s28  ;;  %s46_s18 = sadd.s32 1, %s1919_s28 }
  0x11   : > { %2272 = sst [smem:[#allocation11_spill]] %s1923_s29  ;;  %s419_s19 = sadd.s32 1, %s1911_s26 }
  0x12   : > { %p48_p0 = scmp.ge.s32.totalorder %s46_s18, 2  ;;  %p429_p1 = scmp.ne.s32.totalorder %s1911_s26, %s1907_s25 }
  0x13   : > { %p430_p2 = scmp.eq.s32.totalorder %s1647_s0, 1  ;;  %p435_p3 = scmp.ne.s32.totalorder %s1907_s25, %s1903_s24 }
  0x14   : > { %s2296_s18 = smov (%p48_p0, %s46_s18), 0  ;;  %p436_p5 = scmp.eq.s32.totalorder %s1648_s30, 1 }
  0x15   : > { %2273 = sst [smem:[#allocation12_spill]] %s2296_s18  ;;  %p2059_p4 = por %p430_p2, %p429_p1 }
  0x16   : > { %s414_s20 = ssub.s32 %s1919_s28, %s2296_s18  ;;  %p1651_p6 = scmp.ge.s32.totalorder %s1923_s29, 1 }
  0x17   : > { %p417_p7 = scmp.eq.s32.totalorder %s414_s20, 0  ;;  %p2066_p8 = por %p436_p5, %p435_p3 }
  0x18   : > { %p570_p9 = scmp.lt.s32.totalorder %s1923_s29, 3 }
  0x19   : > { %s2275_s21 = scalar_select %p2066_p8, 1, 0 }
  0x1a   : > { %s2072_s22 = scalar_select %p417_p7, %s1911_s26, %s419_s19  }
  0x1b   : > { %2276 = sst [smem:[#allocation13_spill]] %s2275_s21  ;;  %p571_p10 = pnand %p1651_p6, %p570_p9 }
  0x1c   : > { %2277 = sst [smem:[#allocation14_spill]] %s2072_s22  ;;  %p659_p11 = scmp.lt.s32.totalorder (!%p571_p10), %s1915_s27, 1  ;;  %v1925_v0 = vmov (!%p571_p10), 0   ;;  %vm772_vm0 = vcmask (!%p571_p10), 1041408   ;;  %vm768_vm1 = vcmask (!%p571_p10), 687104   ;;  %v1926_v16 = vmov (!%p571_p10), 0.0  }
  0x1d   : > { %574 = sbr.rel (%p571_p10) target bundleno = 787 (0x313), region = 84  ;;  %811 = vmatprep.mubr.bf16.mxu0 (!%p571_p10), %v1925_v0  ;;  %1768 = vset.pattern.permute.xlu1 (!%p571_p10), %v1925_v0  ;;  %s2278_s19 = sld [smem:[#allocation15_spill]] (!%p571_p10)  ;;  %v1043_v17 = vld [vmem:[%s2246_s11] sm:$0xf] (!%p571_p10)  ;;  %vm911_vm2 = vcmask (!%p571_p10), 1045504   ;;  %vm824_vm3 = vcmask (!%p571_p10), 64512  }
  0x1e   : > { %1767 = vset.pattern.permute.xlu0 (!%p571_p10), %v1925_v0  ;;  %s2279_s4 = sld [smem:[#allocation18_spill]] (!%p571_p10)  ;;  %s2280_s22 = sld [smem:[#allocation16_spill]] (!%p571_p10)  ;;  %892 = vmatprep.mubr.f32.mxu1 (!%p571_p10), %v1926_v16  ;;  %v1237_v18 = vld [vmem:[%s2250_s15] sm:$0xf] (!%p571_p10)  ;;  %vm907_vm4 = vcmask (!%p571_p10), 97280   ;;  %vm1355_vm5 = vcmask (!%p571_p10), 1043456  }
  0x1f   : > { %1046 = vperm.xlu1 (!%p571_p10), %1768, %v1043_v17   ;;  %1240 = vperm.xlu0 (!%p571_p10), %1767, %v1237_v18   ;;  %v962_v19 = vld [vmem:[%s2244_s9] sm:$0xf] (!%p571_p10)  ;;  %s2281_s2 = sld [smem:[#allocation17_spill]] (!%p571_p10)  ;;  %s2282_s6 = sld [smem:[#allocation20_spill]] (!%p571_p10)  ;;  %vm1351_vm6 = vcmask (!%p571_p10), 31744  }
  0x20   : > { %v1156_v20 = vld [vmem:[%s2248_s13] sm:$0xf] (!%p571_p10)  ;;  %s2283_s5 = sld [smem:[#allocation19_spill]] (!%p571_p10)  ;;  %s1927_s24 = smov (!%p571_p10), [#allocation2]  }
  0x21   : > { %v961_v32 = vld [vmem:[%s2243_s8] sm:$0xf] (!%p571_p10) }
  0x22   : > { %v1042_v33 = vld [vmem:[%s2245_s10] sm:$0xf] (!%p571_p10) }
  0x23   : > { %965 = vperm.xlu1 (!%p571_p10), %1768, %v962_v19   ;;  %1159 = vperm.xlu0 (!%p571_p10), %1767, %v1156_v20   ;;  %v1155_v34 = vld [vmem:[%s2247_s12] sm:$0xf] (!%p571_p10) }
  0x24   : > { %s2078_s23 = scalar_select %p659_p11, %s1915_s27, 1  ;;  %v701_v15 = vld [vmem:[%s2279_s4] sm:$0xf] }
  0x25   : > { %v823_v25 = vld [vmem:[%s2282_s6] sm:$0xff]  ;;  %s1817_s4 = sshll.u32 %s1927_s24, 4  ;;  %s1818_s4 = int_to_ptr.vmem [resolvable:$false] %s1817_s4 }
  0x26   : > { %s1704_s0 = smul.u32 88, %s2078_s23  ;;  %s1699_s20 = sshll.u32 %s2078_s23, 4  ;;  %v820_v30 = vld [vmem:[%s2283_s5] sm:$0xf] }
  0x27   : > { %s676_s26 = scalar_lea.vmem %s2280_s22, %s1699_s20  ;;  %s686_s29 = scalar_lea.vmem %s2281_s2, %s1699_s20  ;;  %v1236_v35 = vld [vmem:[%s2249_s14] sm:$0xf] }
  0x28   : > { %s666_s18 = scalar_lea.vmem %s2278_s19, %s1704_s0  ;;  %v1788_v21 = vld [vmem:[%s676_s26] ss:$8 sps:$4 sm:$0x3f]   ;;  %v1786_v23 = vld [vmem:[%s676_s26 + $0x4] ss:$8 sps:$4 sm:$0x3f]  }
  0x29   : > { %v1769_v1 = vld [vmem:[%s666_s18 + $0x4] ss:$8 sps:$4 sm:$0xff]   ;;  %v1771_v2 = vld [vmem:[%s666_s18] ss:$8 sps:$4 sm:$0xff]   ;;  %v1772_v3 = vld [vmem:[%s666_s18 + $0x14] ss:$8 sps:$4 sm:$0xff]  }
  0x2a   : > { %779 = vmatprep.subr.bf16.mxu0 %v1769_v1  ;;  %v1774_v4 = vld [vmem:[%s666_s18 + $0x10] ss:$8 sps:$4 sm:$0xff]   ;;  %v1775_v5 = vld [vmem:[%s666_s18 + $0x24] ss:$8 sps:$4 sm:$0xff]   ;;  %v1777_v6 = vld [vmem:[%s666_s18 + $0x20] ss:$8 sps:$4 sm:$0xff]  }
  0x2b   : > { %780 = vmatpush1.bf16.msra.mxu0 %v1771_v2  ;;  %v1778_v7 = vld [vmem:[%s666_s18 + $0x34] ss:$8 sps:$4 sm:$0xff]   ;;  %v1780_v8 = vld [vmem:[%s666_s18 + $0x30] ss:$8 sps:$4 sm:$0xff]   ;;  %v1781_v9 = vld [vmem:[%s666_s18 + $0x44] ss:$8 sps:$4 sm:$0xff]  }
  0x2c   : > { %781 = vmatprep.subr.bf16.mxu0 %v1772_v3  ;;  %v712_v10 = vld [vmem:[%s666_s18 + $0x50] sm:$0x33]  ;;  %v1783_v11 = vld [vmem:[%s666_s18 + $0x40] ss:$8 sps:$4 sm:$0xff]   ;;  %v913_v27 = vsel %vm911_vm2, %v1788_v21, 0  ;;  %s2261_s26 = sshll.u32 %s1915_s27, 7 }
  0x2d   : > { %v1672_v12 = vcombine.high %v712_v10, %v712_v10  ;;  %v1671_v13 = vcombine.low %v712_v10, %v712_v10  ;;  %v960_v29 = vld [vmem:[%s686_s29 + $0x8] sm:$0xff]  ;;  %v959_v31 = vld [vmem:[%s686_s29] sm:$0xff]  ;;  %s2142_s29 = sand.u32 1, %s1907_s25   ;;  %s2156_s18 = scalar_lea.hbm %s2251_s16, %s2261_s26 }
  0x2e   : > { %s1652_s21 = sshll.u32 %s2142_s29, 3  ;;  %s1445_s30 = scalar_lea.sflag [#allocation3], %s2142_s29 }
  0x2f   : > { %782 = vmatpush1.bf16.msra.mxu0 %v1774_v4  ;;  %v774_v14 = vsel %vm772_vm0, %v1671_v13, 0  ;;  %s650_s22 = scalar_lea.vmem [#allocation2], %s1652_s21  ;;  %s1819_s17 = scalar_lea.vmem %s1818_s4, 256 }
  0x30   : > { %783 = vmatprep.subr.bf16.mxu0 %v1775_v5  ;;  %s1466_s0 = sshll.u32 %s650_s22, 4  ;;  %s1467_s0 = int_to_ptr.vmem [resolvable:$true] %s1466_s0 }
  0x31   : > { %s1813_s28 = scalar_lea.vmem %s1467_s0, 128  ;;  %p1820_p1 = scmp.lt.s32.totalorder %s1467_s0, %s1818_s4 }
  0x32   : > { %p1814_p12 = scmp.ne.s32.totalorder %s1467_s0, %s1813_s28  ;;  %p1821_p2 = scmp.lt.s32.totalorder %s1819_s17, %s1813_s28 }
  0x33   : > { %784 = vmatpush1.bf16.msra.mxu0 %v1777_v6 }
  0x34   : > { %785 = vmatprep.subr.bf16.mxu0 %v1778_v7  ;;  %p1815_p13 = pnand %p1814_p12, %p2059_p4  ;;  %p1822_p3 = por %p1821_p2, %p1820_p1 }
  0x36   : > { %p1816_p0 = pneg %p1815_p13 }
  0x37   : > { %786 = vmatpush1.bf16.msra.mxu0 %v1780_v8 }
  0x38   : > { %787 = vmatprep.subr.bf16.mxu0 %v1781_v9  ;;  %p1823_p5 = pnand %p1822_p3, %p1816_p0 }
  0x3b   : > { %788 = vmatpush1.bf16.msra.mxu0 %v1783_v11 }
  0x3c   : > { %1673 = vmatprep.subr.msk.bf16.mxu0 %vm772_vm0, %v1672_v12 }
  0x3f   : > { %790 = vmatpush1.bf16.msra.mxu0 %v774_v14 }
  0x42   : > { %1674 = vmatmul.mubr.msk.bf16.vlgmr.msra.gmra.mrb[0].mxu0 %vm768_vm1, %v701_v15 }
  0x9e   : > { %v1047_v39 = vpop.permute.xlu1 %1046  ;;  %v1241_v47 = vpop.permute.xlu0 %1240 }
  0xa2   : > { %v966_v45 = vpop.permute.xlu1 %965  ;;  %v1160_v57 = vpop.permute.xlu0 %1159 }
 0x115   : > { %v2104_v22 = vpop.f32.mrb[0].mxu0 }
 0x116   : > { %v2109_v24 = vpop.f32.mrb[1].mxu0 }
 0x117   : > { %v817_v26 = vpop.f32.mrb[2].mxu0  ;;  %828 = vmatprep.subr.mxu1 %v2109_v24 }
 0x118   : > { %v818_v28 = vpop.f32.mrb[3].mxu0  ;;  %829 = vmatpush1.msra.mxu1 %v2104_v22 }
 0x119   : > { %1675 = vmatmul.mubr.msk.f32.vlgmr.msra.gmra.mrb[0].mxu1 %vm824_vm3, %v823_v25  ;;  %1678 = vmatprep.subr.msk.bf16.mxu1 %vm911_vm2, %v1786_v23 }
 0x11a   : > { %919 = vmatpush1.bf16.msra.mxu1 %v913_v27  ;;  %950 = vmatprep.mubr.bf16.mxu1 %v1925_v0 }
 0x11b   : > { %971 = vmatprep.subr.mxu1 %v960_v29 }
 0x11d   : > { %1679 = vmatmul.mubr.msk.bf16.vlgmr.msra.gmra.mrb[4].mxu1 %vm907_vm4, %v820_v30 }
 0x11e   : > { %972 = vmatpush1.msra.mxu1 %v959_v31  ;;  %1035 = vmatprep.mubr.f32.mxu1 %v1926_v16 }
 0x11f   : > { %1052 = vmatprep.subr.mxu1 %v960_v29 }
 0x125   : > { %1680 = vmatmul.mubr.msk.f32.vlgmr.msra.gmra.mrb[2].mxu1 %vm824_vm3, %v961_v32 }
 0x126   : > { %1053 = vmatpush1.msra.mxu1 %v959_v31  ;;  %1116 = vmatprep.mubr.f32.mxu1 %v1926_v16 }
 0x127   : > { %1165 = vmatprep.subr.mxu1 %v960_v29 }
 0x129   : > { %1681 = vmatmul.mubr.msk.f32.vlgmr.msra.gmra.mrb[8].mxu1 %vm824_vm3, %v1042_v33 }
 0x12a   : > { %1166 = vmatpush1.msra.mxu1 %v959_v31  ;;  %1229 = vmatprep.mubr.f32.mxu1 %v1926_v16 }
 0x12b   : > { %1246 = vmatprep.subr.mxu1 %v960_v29 }
 0x12d   : > { %1684 = vmatmul.mubr.msk.f32.vlgmr.msra.gmra.mrb[10].mxu1 %vm824_vm3, %v1155_v34 }
 0x12e   : > { %1247 = vmatpush1.msra.mxu1 %v959_v31  ;;  %1310 = vmatprep.mubr.f32.mxu1 %v1926_v16 }
 0x131   : > { %1685 = vmatmul.mubr.msk.f32.vlgmr.msra.gmra.mrb[12].mxu1 %vm824_vm3, %v1236_v35 }
 0x132   : > { %1426 = vmatprep.mubr.f32.mxu1 %v1926_v16 }
 0x1ec   : > { %v894_v36 = vpop.f32.mrb[0].mxu1 }
 0x1ed   : > { %v896_v37 = vpop.f32.mrb[1].mxu1 }
 0x1f0   : > { %v952_v38 = vpop.f32.mrb[4].mxu1 }
 0x1f1   : > { %v953_v40 = vadd.f32 %v952_v38, %v894_v36  ;;  %v954_v41 = vpop.f32.mrb[5].mxu1 }
 0x1f2   : > { %v955_v42 = vadd.f32 %v954_v41, %v896_v37  ;;  %v956_v43 = vpop.f32.mrb[6].mxu1  ;;  %v1350_v41 = vld [vmem:[%s2242_s7] sm:$0xf] }
 0x1f3   : > { %v957_v44 = vpop.f32.mrb[7].mxu1 }
 0x1f8   : > { %v1037_v46 = vpop.f32.mrb[2].mxu1 }
 0x1f9   : > { %v1038_v48 = vadd.f32 %v1037_v46, %v966_v45  ;;  %v1039_v49 = vpop.f32.mrb[3].mxu1 }
 0x1fa   : > { %v1040_v50 = vadd.f32 %v1039_v49, %v966_v45 }
 0x1fb   : > { %v1123_v51 = vadd.f32 %v1038_v48, %v2104_v22 }
 0x1fc   : > { %v1124_v52 = vadd.f32 %v1040_v50, %v2109_v24  ;;  %v1118_v53 = vpop.f32.mrb[8].mxu1 }
 0x1fd   : > { %v1119_v54 = vadd.f32 %v1118_v53, %v1047_v39  ;;  %v1120_v55 = vpop.f32.mrb[9].mxu1 }
 0x1fe   : > { %v1121_v56 = vadd.f32 %v1120_v55, %v1047_v39 }
 0x1ff   : > { %v1129_v58 = vrot.slane %v1119_v54, 4 }
 0x200   : > { %v1130_v59 = vrot.slane %v1121_v56, 4  ;;  %v1231_v60 = vpop.f32.mrb[10].mxu1 }
 0x201   : > { %v1133_v61 = vadd.f32 %v1129_v58, %v2104_v22  ;;  %v1232_v62 = vadd.f32 %v1231_v60, %v1160_v57  ;;  %v1233_v63 = vpop.f32.mrb[11].mxu1 }
 0x202   : > { %v1134_v0 = vadd.f32 %v1130_v59, %v2109_v24  ;;  %v1234_v1 = vadd.f32 %v1233_v63, %v1160_v57 }
 0x203   : > { %v1682_v2 = vmul.f32 -1.442695, %v1133_v61  ;;  %v1317_v3 = vadd.f32 %v1232_v62, %v953_v40 }
 0x204   : > { %v1683_v4 = vmul.f32 -1.442695, %v1134_v0  ;;  %v1318_v5 = vadd.f32 %v1234_v1, %v955_v42  ;;  %v1312_v6 = vpop.f32.mrb[12].mxu1 }
 0x205   : > { %1789 = vpow2.f32 %v1682_v2  ;;  %v1313_v7 = vadd.f32 %v1312_v6, %v1241_v47  ;;  %v1314_v8 = vpop.f32.mrb[13].mxu1 }
 0x206   : > { %1791 = vpow2.f32 %v1683_v4  ;;  %v1315_v9 = vadd.f32 %v1314_v8, %v1241_v47 }
 0x207   : > { %v1323_v10 = vrot.slane %v1313_v7, 4 }
 0x208   : > { %v1324_v11 = vrot.slane %v1315_v9, 4 }
 0x209   : > { %v1327_v12 = vadd.f32 %v1323_v10, %v953_v40 }
 0x20a   : > { %v1328_v13 = vadd.f32 %v1324_v11, %v955_v42 }
 0x20b   : > { %v1686_v14 = vmul.f32 -1.442695, %v1327_v12 }
 0x20c   : > { %v1687_v15 = vmul.f32 -1.442695, %v1328_v13 }
 0x20d   : > { %1793 = vpow2.f32 %v1686_v14 }
 0x20e   : > { %1795 = vpow2.f32 %v1687_v15 }
 0x20f   : > { %v1790_v16 = vpop.eup %1789 }
 0x210   : > { %v1792_v17 = vpop.eup %1791  ;;  %v1141_v18 = vadd.f32 1.0, %v1790_v16 }
 0x211   : > { %v1142_v19 = vadd.f32 1.0, %v1792_v17 }
 0x212   : > { %1797 = vrcp.f32 %v1141_v18 }
 0x213   : > { %1799 = vrcp.f32 %v1142_v19 }
 0x214   : > { %1801 = vtanh.f32 %v1123_v51 }
 0x215   : > { %1803 = vtanh.f32 %v1124_v52 }
 0x217   : > { %v1794_v20 = vpop.eup %1793 }
 0x218   : > { %v1796_v21 = vpop.eup %1795  ;;  %v1335_v22 = vadd.f32 1.0, %v1794_v20 }
 0x219   : > { %v1336_v23 = vadd.f32 1.0, %v1796_v21 }
 0x21a   : > { %1805 = vrcp.f32 %v1335_v22 }
 0x21b   : > { %1807 = vrcp.f32 %v1336_v23 }
 0x21c   : > { %v1798_v24 = vpop.eup %1797  ;;  %1809 = vtanh.f32 %v1317_v3 }
 0x21d   : > { %v1800_v25 = vpop.eup %1799  ;;  %1811 = vtanh.f32 %v1318_v5  ;;  %v1149_v26 = vrot.slane %v1798_v24, 4 }
 0x21e   : > { %v1802_v27 = vpop.eup %1801  ;;  %v1150_v28 = vrot.slane %v1800_v25, 4 }
 0x21f   : > { %v1804_v29 = vpop.eup %1803  ;;  %v1153_v30 = vmul.f32 %v1802_v27, %v1149_v26 }
 0x220   : > { %v1154_v31 = vmul.f32 %v1804_v29, %v1150_v28 }
 0x222   : > { %v1440_v32 = vcombine.low %v1153_v30, %v1154_v31 }
 0x224   : > { %v1806_v33 = vpop.eup %1805  ;;  %1442 = vst [vmem:[%s650_s22] sm:$0xff] %v1440_v32 }
 0x225   : > { %v1808_v34 = vpop.eup %1807  ;;  %v1343_v35 = vrot.slane %v1806_v33, 4 }
 0x226   : > { %v1810_v36 = vpop.eup %1809  ;;  %v1344_v37 = vrot.slane %v1808_v34, 4 }
 0x227   : > { %v1812_v38 = vpop.eup %1811  ;;  %v1347_v39 = vmul.f32 %v1810_v36, %v1343_v35 }
 0x228   : > { %v1348_v40 = vmul.f32 %v1812_v38, %v1344_v37 }
 0x22a   : > { %1688 = vmatprep.subr.msk.mxu1 %vm1355_vm5, %v1348_v40 }
 0x22b   : > { %1689 = vmatpush1.msk.msra.mxu1 %vm1355_vm5, %v1347_v39 }
 0x22c   : > { %1690 = vmatmul.mubr.msk.f32.vlgmr.msra.gmra.mrb[14].mxu1 %vm1351_vm6, %v1350_v41 }
 0x22d   : > { %1826 = shalt.err (!%p1823_p5)
}
 0x22e   : > { %s1827_s22 = scalar_lea.hbm %s2156_s18, 128  ;;  %s1831_s24 = scalar_lea.hbm %s2251_s16, 256 }
 0x22f   : > { %p1828_p6 = scmp.ne.s32.totalorder %s2156_s18, %s1827_s22  ;;  %p1832_p10 = scmp.lt.u32.totalorder %s2156_s18, %s2251_s16 }
 0x230   : > { %p1833_p11 = scmp.lt.u32.totalorder %s1831_s24, %s1827_s22  ;;  %p1835_p13 = scmp.lt.u32.totalorder %s1827_s22, %s2156_s18 }
 0x231   : > { %p1829_p7 = pnand %p1828_p6, %p2059_p4 }
 0x232   : > { %p1834_p12 = por %p1833_p11, %p1832_p10 }
 0x233   : > { %p1830_p9 = pneg %p1829_p7 }
 0x234   : > { %p1836_p0 = por %p1835_p13, %p1834_p12 }
 0x236   : > { %p1837_p1 = pnand %p1836_p0, %p1830_p9 }
 0x238   : > { %1840 = shalt.err (!%p1837_p1)
}
 0x239   : > { %1705 = dma.vmem_to_hbm [thread:$0]  (%p2059_p4), %s1467_s0, 128, %s2156_s18, %s1445_s30  }
 0x23a   : > { %s1701_s28 = sshll.u32 %s2078_s23, 3  ;;  %s657_s22 = scalar_lea.vmem [#allocation4], %s1652_s21 }
 0x23b   : > { %s696_s26 = scalar_lea.vmem %s2238_s3, %s1701_s28  ;;  %s1482_s19 = sshll.u32 %s657_s22, 4  ;;  %s2189_s19 = int_to_ptr.vmem [resolvable:$true] %s1482_s19 }
 0x23c   : > { %v1349_v43 = vld [vmem:[%s696_s26] sm:$0xff]  ;;  %s2284_s24 = sshll.u32 %s1915_s27, 7  ;;  %s2285_s5 = sld [smem:[#allocation21_spill]] }
 0x23d   : > { %s1450_s23 = scalar_lea.sflag [#allocation5], %s2142_s29  ;;  %s1841_s18 = scalar_lea.vmem %s2189_s19, 128 }
 0x23e   : > { %p1842_p2 = scmp.ne.s32.totalorder %s2189_s19, %s1841_s18  ;;  %s1928_s21 = smov [#allocation4]  }
 0x23f   : > { %s1845_s0 = sshll.u32 %s1928_s21, 4  ;;  %s1846_s0 = int_to_ptr.vmem [resolvable:$false] %s1845_s0 }
 0x240   : > { %p1843_p3 = pnand %p1842_p2, %p2059_p4  ;;  %s1847_s27 = scalar_lea.vmem %s1846_s0, 256 }
 0x241   : > { %p1848_p6 = scmp.lt.s32.totalorder %s2189_s19, %s1846_s0  ;;  %p1849_p7 = scmp.lt.s32.totalorder %s1847_s27, %s1841_s18 }
 0x242   : > { %s2187_s6 = scalar_lea.hbm %s2285_s5, %s2284_s24  ;;  %p1844_p5 = pneg %p1843_p3 }
 0x243   : > { %p1850_p9 = por %p1849_p7, %p1848_p6 }
 0x245   : > { %p1851_p10 = pnand %p1850_p9, %p1844_p5 }
 0x2ff   : > { %v1428_v42 = vpop.f32.mrb[14].mxu1 }
 0x300   : > { %v1430_v44 = vpop.f32.mrb[15].mxu1 }
 0x301   : > { %v1435_v45 = vcombine.low %v1428_v42, %v1430_v44 }
 0x303   : > { %v1437_v46 = vadd.f32 %v1435_v45, %v1349_v43 }
 0x305   : > { %1443 = vst [vmem:[%s657_s22] sm:$0xff] %v1437_v46 }
 0x306   : > { %1854 = shalt.err (!%p1851_p10)
}
 0x307   : > { %s1855_s2 = scalar_lea.hbm %s2187_s6, 128  ;;  %s1859_s28 = scalar_lea.hbm %s2285_s5, 256 }
 0x308   : > { %p1856_p11 = scmp.ne.s32.totalorder %s2187_s6, %s1855_s2  ;;  %p1860_p0 = scmp.lt.u32.totalorder %s2187_s6, %s2285_s5 }
 0x309   : > { %p1861_p1 = scmp.lt.u32.totalorder %s1859_s28, %s1855_s2  ;;  %p1863_p3 = scmp.lt.u32.totalorder %s1855_s2, %s2187_s6 }
 0x30a   : > { %p1857_p12 = pnand %p1856_p11, %p2059_p4 }
 0x30b   : > { %p1862_p2 = por %p1861_p1, %p1860_p0 }
 0x30c   : > { %p1858_p13 = pneg %p1857_p12 }
 0x30d   : > { %p1864_p5 = por %p1863_p3, %p1862_p2 }
 0x30f   : > { %p1865_p6 = pnand %p1864_p5, %p1858_p13 }
 0x311   : > { %1868 = shalt.err (!%p1865_p6)
}
 0x312   : > { %1706 = dma.vmem_to_hbm [thread:$0]  (%p2059_p4), %s2189_s19, 128, %s2187_s6, %s1450_s23  }
 0x313 PF: > { %s2286_s26 = sld [smem:[#allocation11_spill]]  ;;  %s2287_s22 = sld [smem:[#allocation8_spill]] }
 0x319   : > { %p1716_p7 = scmp.ge.s32.totalorder %s2286_s26, 2  ;;  %s1494_s4 = sand.u32 1, %s2287_s22  }
 0x31a   : > { %s1495_s18 = scalar_lea.sflag [#allocation3], %s1494_s4 }
 0x31b   : > { %p1710_p9 = pnand %p1716_p7, %p2066_p8 }
 0x31d   : > { %1894 = dma.done.wait (!%p1710_p9), %s1495_s18, 128  }
 0x31e   : > { %1896 = vsyncadd (!%p1710_p9), %s1495_s18, 4294967168  ;;  %s1504_s21 = scalar_lea.sflag [#allocation5], %s1494_s4 }
 0x31f   : > { %1898 = dma.done.wait (!%p1710_p9), %s1504_s21, 128  }
 0x320   : > { %1900 = vsyncadd (!%p1710_p9), %s1504_s21, 4294967168  ;;  %s34_s29 = sadd.s32 1, %s2286_s26   ;;  %s2289_s1 = sld [smem:[#allocation9_spill]] }
 0x321   : > { %p31_p10 = scmp.ge.s32.totalorder %s34_s29, 4   ;;  %s2290_s26 = sld [smem:[#allocation14_spill]] }
 0x322   : > { %s2291_s27 = sld [smem:[#allocation10_spill]]  ;;  %s2292_s28 = sld [smem:[#allocation12_spill]] }
 0x323   : > { %s2293_s24 = smov %s1907_s25  ;;  %33 = sbr.rel (!%p31_p10) target bundleno = 14 (0xe), region = 145 }
 0x326   : > { %s2294_s25 = smov %s2289_s1 }
 0x32a   :  { %1509 = vsyncpa [#allocation3], 1 }
 0x32b   :  { %1511 = vsyncpa [#allocation3 + $0x1], 1 }
 0x32c   :  { %1512 = vsyncpa [#allocation5], 1 }
 0x32d   :  { %1514 = vsyncpa [#allocation5 + $0x1], 1 }

</bundles_post_ra>
